<compile_context>
chip_gen: v6e
topology: v6e:2x2x1
jax: 0.10.0
libtpu: 0.0.40
codegen_flags: <defaults>
</compile_context>

<pallas_src>
import math

import jax
import jax.numpy as jnp
from jax.experimental import pallas as pl
from jax.experimental.pallas import tpu as pltpu

_MIB = 1024 * 1024
_TINY_TABLE_BYTES = 2 * _MIB   # VMEM-resident one-hot path only below this
_NSEM = 8                      # outstanding row DMAs per grid step (gather path)


def _round_up(x, m):
    return ((x + m - 1) // m) * m


def _vmem_capacity_bytes():
    """Per-core VMEM capacity (generation aware), with a conservative fallback."""
    try:
        return int(pltpu.get_tpu_info().vmem_capacity_bytes)
    except Exception:
        return 64 * _MIB   # conservative: v7x per-TensorCore VMEM


# --------------------------------------------------------------------------
# Path 1: tiny tables — table resident in VMEM, gather via exact one-hot MXU
# --------------------------------------------------------------------------
def _onehot_path(ids_flat, table, scale, block_tokens):
    n_tok = ids_flat.shape[0]
    V, D = table.shape
    itemsize = table.dtype.itemsize

    # Fold factor k: smallest k with (k*D) % 128 == 0 -> lane-dense output tiles.
    k = 128 // math.gcd(D, 128)

    # Target Tk ~ 256 (fills MXU rows on v6e/v7x, 2x128 tiles on v5e), bounded so
    # the (Tk, V) int32 iota + one-hot temporaries stay modest.
    tk_target = 256
    while tk_target > 8 and tk_target * V * 8 > 24 * _MIB:
        tk_target //= 2
    max_T = block_tokens if block_tokens is not None else tk_target * k
    T = _round_up(min(max(max_T, 1), max(n_tok, 1)), 8 * k)
    Tk = T // k

    n_pad = _round_up(n_tok, T)
    if n_pad != n_tok:
        ids_flat = jnp.concatenate(
            [ids_flat, jnp.zeros((n_pad - n_tok,), jnp.int32)]
        )
    n_blocks = n_pad // T
    ids_resh = ids_flat.reshape(n_blocks, Tk, k)   # token i*T + r*k + j -> [i, r, j]

    # VMEM budget: table (worst-case 2x buffered), double-buffered ids/out blocks,
    # (Tk, V) iota + one live one-hot, and one (Tk, D) f32 partial.
    vmem_needed = (2 * V * D * itemsize
                   + 2 * Tk * k * 4
                   + 2 * Tk * k * D * itemsize
                   + 2 * Tk * V * 4
                   + Tk * D * 4)
    cap = _vmem_capacity_bytes()
    vmem_limit = int(min(max(2 * vmem_needed, 16 * _MIB), int(0.75 * cap)))

    def kernel(ids_ref, tab_ref, out_ref):
        idsm = ids_ref[0]                                  # (Tk, k) int32 token ids
        tab = tab_ref[...]                                 # (V, D) table, VMEM resident
        vocab_iota = jax.lax.broadcasted_iota(jnp.int32, (Tk, V), 1)   # hoisted
        # TODO(synk): switch the one-hot to bf16 (3 MXU passes instead of 6) once a
        # mixed-dtype bf16 x f32 dot is guaranteed to lower in Mosaic; this path is
        # restricted to <=2 MiB tables so the extra MXU work is bounded.
        for j in range(k):                                 # static unroll over lane groups
            col = idsm[:, j:j + 1]                         # (Tk, 1)
            oh = (col == vocab_iota).astype(tab.dtype)     # exact 0/1 one-hot
            part = jnp.dot(
                oh, tab,
                preferred_element_type=jnp.float32,
                precision=jax.lax.Precision.HIGHEST,       # exact row gather
            )                                              # (Tk, D)
            # Per-group store bounds liveness to one one-hot + one partial
            # (no parts list / concatenate relayout).
            out_ref[:, j * D:(j + 1) * D] = (part * scale).astype(out_ref.dtype)

    out_folded = pl.pallas_call(
        kernel,
        out_shape=jax.ShapeDtypeStruct((n_blocks * Tk, k * D), table.dtype),
        grid=(n_blocks,),
        in_specs=[
            # T token ids per step, laid out (Tk, k): lane group j of output row r
            # corresponds to token r*k + j of this block.
            pl.BlockSpec((1, Tk, k), lambda i: (i, 0, 0)),
            # Full embedding table, constant block index -> stays resident in VMEM.
            pl.BlockSpec((V, D), lambda i: (0, 0)),
        ],
        # Lane-dense output tile: last dim k*D is a multiple of 128.
        out_specs=pl.BlockSpec((Tk, k * D), lambda i: (i, 0)),
        compiler_params=pltpu.CompilerParams(
            dimension_semantics=("parallel",),
            vmem_limit_bytes=vmem_limit,
        ),
    )(ids_resh, table)

    # Unfold lanes back to (token, D): pure row-major reshape, drop padding.
    return out_folded.reshape(n_pad, D)[:n_tok]


# --------------------------------------------------------------------------
# Path 2 (main): HBM row-gather with scalar-prefetched ids + manual DMAs
# --------------------------------------------------------------------------
def _gather_path(ids_flat, table, scale, block_tokens):
    n_tok = ids_flat.shape[0]
    V, D = table.shape
    itemsize = table.dtype.itemsize

    t_max = block_tokens if block_tokens is not None else 512
    # Bound VMEM: gather buffer + double-buffered output blocks.
    while t_max > 8 and 3 * t_max * D * itemsize > 24 * _MIB:
        t_max //= 2
    T = _round_up(min(max(t_max, 1), max(n_tok, 1)), 8)

    n_pad = _round_up(n_tok, T)
    if n_pad != n_tok:
        ids_flat = jnp.concatenate(
            [ids_flat, jnp.zeros((n_pad - n_tok,), jnp.int32)]
        )
    n_blocks = n_pad // T

    cap = _vmem_capacity_bytes()
    vmem_needed = 3 * T * D * itemsize + 1 * _MIB
    vmem_limit = int(min(max(2 * vmem_needed, 16 * _MIB), int(0.75 * cap)))

    def kernel(ids_ref, tab_hbm, out_ref, gbuf, sems):
        i = pl.program_id(0)
        base = i * T

        def start_fetch(t):
            tok = ids_ref[base + t]                        # scalar id from SMEM
            pltpu.make_async_copy(
                tab_hbm.at[tok], gbuf.at[t], sems.at[t % _NSEM]
            ).start()

        # Prime the pipeline with _NSEM outstanding row DMAs.
        for t in range(min(_NSEM, T)):
            start_fetch(t)

        @pl.loop(0, T)
        def _(t):
            # Wait for row t (src index is a dummy; the wait only needs the
            # destination shape + semaphore slot).
            pltpu.make_async_copy(
                tab_hbm.at[0], gbuf.at[t], sems.at[t % _NSEM]
            ).wait()

            @pl.when(t + _NSEM < T)
            def _():
                start_fetch(t + _NSEM)                     # keep _NSEM in flight

        out_ref[...] = (gbuf[...] * scale).astype(out_ref.dtype)

    out_flat = pl.pallas_call(
        kernel,
        out_shape=jax.ShapeDtypeStruct((n_pad, D), table.dtype),
        grid_spec=pltpu.PrefetchScalarGridSpec(
            num_scalar_prefetch=1,                         # ids -> SMEM
            grid=(n_blocks,),
            in_specs=[pl.BlockSpec(memory_space=pl.ANY)],  # table stays in HBM
            out_specs=pl.BlockSpec((T, D), lambda i, ids: (i, 0)),
            scratch_shapes=[
                pltpu.VMEM((T, D), table.dtype),           # gather buffer
                pltpu.SemaphoreType.DMA((_NSEM,)),
            ],
        ),
        compiler_params=pltpu.CompilerParams(
            dimension_semantics=("parallel",),
            vmem_limit_bytes=vmem_limit,
        ),
    )(ids_flat, table)

    return out_flat[:n_tok]


# --------------------------------------------------------------------------
# Public wrapper (matches Embeddings.forward semantics)
# --------------------------------------------------------------------------
def embeddings_forward(ids, table, *, block_tokens=None, force_gather=False):
    """ids: (B, S) int, table: (V, D) -> (B, S, D) == table[ids] * sqrt(D)."""
    B, S = ids.shape
    V, D = table.shape
    scale = math.sqrt(D)

    # Clamp ids into range so the HBM row DMAs are always in-bounds.
    # (torch.nn.Embedding raises for out-of-range ids; we clamp instead.)
    ids_flat = jnp.clip(ids.reshape(-1).astype(jnp.int32), 0, V - 1)

    table_bytes = V * D * table.dtype.itemsize
    use_onehot = (not force_gather) and table_bytes <= _TINY_TABLE_BYTES

    if use_onehot:
        out_flat = _onehot_path(ids_flat, table, scale, block_tokens)
    else:
        out_flat = _gather_path(ids_flat, table, scale, block_tokens)
    return out_flat.reshape(B, S, D)


if __name__ == "__main__":
    # Small shapes consistent with the module's forward.
    batch, seq = 2, 8
    vocab, d_model = 50, 32

    key = jax.random.PRNGKey(0)
    key_tab, key_ids = jax.random.split(key)

    # nn.Embedding default init: weight ~ N(0, 1)
    lut = jax.random.normal(key_tab, (vocab, d_model), dtype=jnp.float32)
    x = jax.random.randint(key_ids, (batch, seq), minval=0, maxval=vocab, dtype=jnp.int32)

    # Reference: lut[x] * sqrt(d_model)
    ref = jnp.take(lut, x, axis=0) * math.sqrt(d_model)

    # Tiny-table path (VMEM-resident one-hot MXU gather).
    out_small = jax.block_until_ready(embeddings_forward(x, lut))
    assert out_small.shape == (batch, seq, d_model)
    assert jnp.allclose(out_small, ref, atol=1e-5, rtol=1e-5), "one-hot path mismatch"

    # Main path (HBM row-gather with scalar-prefetched ids + manual DMAs).
    out_gather = jax.block_until_ready(embeddings_forward(x, lut, force_gather=True))
    assert out_gather.shape == (batch, seq, d_model)
    assert jnp.allclose(out_gather, ref, atol=1e-5, rtol=1e-5), "gather path mismatch"

    print("KERNEL_OK")
</pallas_src>

<mosaic_0001>
module attributes {stable_mosaic.version = 11 : i64} {
  func.func @kernel(%arg0: i32, %arg1: memref<1x8x4xi32, #tpu.memory_space<vmem>>, %arg2: memref<50x32xf32, #tpu.memory_space<vmem>>, %arg3: memref<8x128xf32, #tpu.memory_space<vmem>>) attributes {dimension_semantics = [#tpu.dimension_semantics<parallel>], iteration_bounds = array<i64: 1>, scalar_prefetch = 0 : i64, scratch_operands = 0 : i64, tpu.core_type = #tpu.core_type<tc>, window_params = [{transform_indices = @transform_0, window_bounds = array<i64: 1, 8, 4>}, {pipeline_mode = #tpu.pipeline_mode<synchronous>, transform_indices = @transform_1, window_bounds = array<i64: 50, 32>}, {transform_indices = @transform_2, window_bounds = array<i64: 8, 128>}]} {
    %c0 = arith.constant 0 : index
    %c0_0 = arith.constant 0 : index
    %c0_1 = arith.constant 0 : index
    %0 = vector.load %arg1[%c0, %c0_0, %c0_1] : memref<1x8x4xi32, #tpu.memory_space<vmem>>, vector<1x8x4xi32>
    %1 = vector.shape_cast %0 : vector<1x8x4xi32> to vector<8x4xi32>
    %c0_2 = arith.constant 0 : index
    %c0_3 = arith.constant 0 : index
    %2 = vector.load %arg2[%c0_2, %c0_3] : memref<50x32xf32, #tpu.memory_space<vmem>>, vector<50x32xf32>
    %3 = tpu.iota {dimensions = array<i32: 1>} : vector<8x50xi32>
    %4 = vector.extract_strided_slice %1 {offsets = [0, 0], sizes = [8, 1], strides = [1, 1]} : vector<8x4xi32> to vector<8x1xi32>
    %5 = vector.broadcast %4 : vector<8x1xi32> to vector<8x50xi32>
    %6 = arith.cmpi eq, %5, %3 : vector<8x50xi32>
    %7 = arith.extui %6 : vector<8x50xi1> to vector<8x50xi32>
    %8 = arith.sitofp %7 : vector<8x50xi32> to vector<8x50xf32>
    %cst = arith.constant dense<0.000000e+00> : vector<8x32xf32>
    %9 = tpu.matmul %8, %2, %cst {dimension_numbers = #tpu.dot_dimension_numbers<[1], [0], [0], [1], [0, 0, 1, 1], [], []>, precision = #tpu.contract_precision<fp32>} : vector<8x50xf32>, vector<50x32xf32>, vector<8x32xf32> -> vector<8x32xf32>
    %cst_4 = arith.constant 5.65685415 : f32
    %10 = vector.broadcast %cst_4 : f32 to vector<8x32xf32>
    %11 = arith.mulf %9, %10 : vector<8x32xf32>
    %c0_5 = arith.constant 0 : index
    %c0_6 = arith.constant 0 : index
    %12 = vector.load %arg3[%c0_5, %c0_6] : memref<8x128xf32, #tpu.memory_space<vmem>>, vector<8x32xf32>
    tpu.vector_store %arg3[%c0_5, %c0_6], %11 {strides = array<i32>} : memref<8x128xf32, #tpu.memory_space<vmem>>, vector<8x32xf32>,
    %13 = vector.extract_strided_slice %1 {offsets = [0, 1], sizes = [8, 1], strides = [1, 1]} : vector<8x4xi32> to vector<8x1xi32>
    %14 = vector.broadcast %13 : vector<8x1xi32> to vector<8x50xi32>
    %15 = arith.cmpi eq, %14, %3 : vector<8x50xi32>
    %16 = arith.extui %15 : vector<8x50xi1> to vector<8x50xi32>
    %17 = arith.sitofp %16 : vector<8x50xi32> to vector<8x50xf32>
    %cst_7 = arith.constant dense<0.000000e+00> : vector<8x32xf32>
    %18 = tpu.matmul %17, %2, %cst_7 {dimension_numbers = #tpu.dot_dimension_numbers<[1], [0], [0], [1], [0, 0, 1, 1], [], []>, precision = #tpu.contract_precision<fp32>} : vector<8x50xf32>, vector<50x32xf32>, vector<8x32xf32> -> vector<8x32xf32>
    %cst_8 = arith.constant 5.65685415 : f32
    %19 = vector.broadcast %cst_8 : f32 to vector<8x32xf32>
    %20 = arith.mulf %18, %19 : vector<8x32xf32>
    %c0_9 = arith.constant 0 : index
    %c32 = arith.constant 32 : index
    %21 = vector.load %arg3[%c0_9, %c32] : memref<8x128xf32, #tpu.memory_space<vmem>>, vector<8x32xf32>
    tpu.vector_store %arg3[%c0_9, %c32], %20 {strides = array<i32>} : memref<8x128xf32, #tpu.memory_space<vmem>>, vector<8x32xf32>,
    %22 = vector.extract_strided_slice %1 {offsets = [0, 2], sizes = [8, 1], strides = [1, 1]} : vector<8x4xi32> to vector<8x1xi32>
    %23 = vector.broadcast %22 : vector<8x1xi32> to vector<8x50xi32>
    %24 = arith.cmpi eq, %23, %3 : vector<8x50xi32>
    %25 = arith.extui %24 : vector<8x50xi1> to vector<8x50xi32>
    %26 = arith.sitofp %25 : vector<8x50xi32> to vector<8x50xf32>
    %cst_10 = arith.constant dense<0.000000e+00> : vector<8x32xf32>
    %27 = tpu.matmul %26, %2, %cst_10 {dimension_numbers = #tpu.dot_dimension_numbers<[1], [0], [0], [1], [0, 0, 1, 1], [], []>, precision = #tpu.contract_precision<fp32>} : vector<8x50xf32>, vector<50x32xf32>, vector<8x32xf32> -> vector<8x32xf32>
    %cst_11 = arith.constant 5.65685415 : f32
    %28 = vector.broadcast %cst_11 : f32 to vector<8x32xf32>
    %29 = arith.mulf %27, %28 : vector<8x32xf32>
    %c0_12 = arith.constant 0 : index
    %c64 = arith.constant 64 : index
    %30 = vector.load %arg3[%c0_12, %c64] : memref<8x128xf32, #tpu.memory_space<vmem>>, vector<8x32xf32>
    tpu.vector_store %arg3[%c0_12, %c64], %29 {strides = array<i32>} : memref<8x128xf32, #tpu.memory_space<vmem>>, vector<8x32xf32>,
    %31 = vector.extract_strided_slice %1 {offsets = [0, 3], sizes = [8, 1], strides = [1, 1]} : vector<8x4xi32> to vector<8x1xi32>
    %32 = vector.broadcast %31 : vector<8x1xi32> to vector<8x50xi32>
    %33 = arith.cmpi eq, %32, %3 : vector<8x50xi32>
    %34 = arith.extui %33 : vector<8x50xi1> to vector<8x50xi32>
    %35 = arith.sitofp %34 : vector<8x50xi32> to vector<8x50xf32>
    %cst_13 = arith.constant dense<0.000000e+00> : vector<8x32xf32>
    %36 = tpu.matmul %35, %2, %cst_13 {dimension_numbers = #tpu.dot_dimension_numbers<[1], [0], [0], [1], [0, 0, 1, 1], [], []>, precision = #tpu.contract_precision<fp32>} : vector<8x50xf32>, vector<50x32xf32>, vector<8x32xf32> -> vector<8x32xf32>
    %cst_14 = arith.constant 5.65685415 : f32
    %37 = vector.broadcast %cst_14 : f32 to vector<8x32xf32>
    %38 = arith.mulf %36, %37 : vector<8x32xf32>
    %c0_15 = arith.constant 0 : index
    %c96 = arith.constant 96 : index
    %39 = vector.load %arg3[%c0_15, %c96] : memref<8x128xf32, #tpu.memory_space<vmem>>, vector<8x32xf32>
    tpu.vector_store %arg3[%c0_15, %c96], %38 {strides = array<i32>} : memref<8x128xf32, #tpu.memory_space<vmem>>, vector<8x32xf32>,
    return
  }
  func.func @transform_0(%arg0: i32) -> (i32, i32, i32) {
    %c0_i32 = arith.constant 0 : i32
    %c0_i32_0 = arith.constant 0 : i32
    %c0_i32_1 = arith.constant 0 : i32
    return %arg0, %c0_i32, %c0_i32_0 : i32, i32, i32
  }
  func.func @transform_1(%arg0: i32) -> (i32, i32) {
    %c0_i32 = arith.constant 0 : i32
    %c0_i32_0 = arith.constant 0 : i32
    %c0_i32_1 = arith.constant 0 : i32
    return %c0_i32, %c0_i32_0 : i32, i32
  }
  func.func @transform_2(%arg0: i32) -> (i32, i32) {
    %c0_i32 = arith.constant 0 : i32
    %c0_i32_0 = arith.constant 0 : i32
    return %arg0, %c0_i32 : i32, i32
  }
}

</mosaic_0001>

<bundles_post_ra>
// kernel: tpu_custom_call.1
= control target key start
LH: loop header
LB: loop body
LE: loop exit
PB: predicated region body
PF: predicated region fallthrough
CT: control target
= control target key end

     0   :  { %v2850_v2 = vmov 0   ;;  %v2851_v3 = vmov 2   ;;  %vm32_vm0 = vcmask 1041408   ;;  %v2852_v13 = vmov 0.0   ;;  %s3435_s0 = inlined_call_operand.vmem [shape: s32[1,8,4], index: 0, kind: input, shape index: {}]   ;;  %s3436_s1 = inlined_call_operand.vmem [shape: f32[50,32], index: 1, kind: input, shape index: {}]   ;;  %s3437_s2 = inlined_call_operand.hbm [shape: f32[8,128], index: 2, kind: output, shape index: {}]  }
   0x1   :  { %v12_v0 = vld [vmem:[%s3435_s0] sm:$0xff]  ;;  %v18_v1 = vld [vmem:[%s3436_s1 + $0x28] sm:$0xff]  ;;  %2823 = vset.pattern.permute.xlu0 %v2850_v2  ;;  %2825 = vset.pattern.permute.xlu1 %v2851_v3  ;;  %v19_v4 = vld [vmem:[%s3436_s1 + $0x30] sm:$0x3] }
   0x2   :  { %v2884_v5 = vand.u32 4294901760, %v18_v1  ;;  %v17_v6 = vld [vmem:[%s3436_s1 + $0x20] sm:$0xff]  ;;  %v16_v7 = vld [vmem:[%s3436_s1 + $0x18] sm:$0xff]  ;;  %23 = vperm.xlu0 %2823, %v12_v0   ;;  %1104 = vperm.xlu1 %2825, %v12_v0   ;;  %v34_v8 = vsel %vm32_vm0, %v19_v4, 0  ;;  %v15_v11 = vld [vmem:[%s3436_s1 + $0x10] sm:$0xff] }
   0x3   :  { %v2892_v9 = vand.u32 4294901760, %v17_v6  ;;  %v2894_v10 = vand.u32 4294901760, %v16_v7  ;;  %v14_v12 = vld [vmem:[%s3436_s1 + $0x8] sm:$0xff]  ;;  %2422 = vmatprep.subr.mxu1 %v2852_v13  ;;  %v2903_v14 = vand.u32 4294901760, %v34_v8  ;;  %2405 = vmatprep.subr.mxu0 %v2852_v13  ;;  %v2909_v16 = vand.u32 4294901760, %v15_v11  ;;  %v13_v18 = vld [vmem:[%s3436_s1] sm:$0xff] }
   0x4   :  { %v2906_v15 = vsub.f32 %v18_v1, %v2884_v5  ;;  %v2911_v17 = vand.u32 4294901760, %v14_v12 }
   0x5   :  { %7 = vsyncpa [#allocation3], 0  ;;  %v2917_v19 = vsub.f32 %v17_v6, %v2892_v9  ;;  %v2920_v20 = vsub.f32 %v16_v7, %v2894_v10  ;;  %v2923_v21 = vsub.f32 %v34_v8, %v2903_v14  ;;  %v2929_v23 = vsub.f32 %v15_v11, %v2909_v16  ;;  %2406 = vmatpush3.msra.mxu0 %v2903_v14  ;;  %s2856_s1 = smov 32   ;;  %s2857_s24 = smov 64  }
   0x6   :  { %v2926_v22 = vand.u32 4294901760, %v2906_v15  ;;  %v2853_v24 = vmov 1   ;;  %2407 = vmatprep.subr.mxu0 %v2852_v13  ;;  %v2937_v26 = vsub.f32 %v14_v12, %v2911_v17  ;;  %v2939_v27 = vand.u32 4294901760, %v13_v18  ;;  %s2858_s25 = smov 96   ;;  %s2859_s26 = smov [#allocation2]  }
   0x7   :  { %2824 = vset.pattern.permute.xlu0 %v2853_v24  ;;  %v2933_v25 = vand.u32 4294901760, %v2917_v19  ;;  %v2942_v28 = vand.u32 4294901760, %v2923_v21  ;;  %v2947_v30 = vand.u32 4294901760, %v2920_v20  ;;  %2408 = vmatpush3.msra.mxu0 %v2884_v5  ;;  %v2854_v31 = vmov 3   ;;  %s2189_s27 = sshll.u32 %s2859_s26, 4  ;;  %s2190_s27 = int_to_ptr.vmem [resolvable:$true] %s2189_s27 }
   0x8   :  { %564 = vperm.xlu0 %2824, %v12_v0   ;;  %v147_v29 = vsub.f32 %v2906_v15, %v2926_v22  ;;  %2826 = vset.pattern.permute.xlu1 %v2854_v31  ;;  %v2956_v34 = vand.u32 4294901760, %v2929_v23  ;;  %v2959_v35 = vsub.f32 %v13_v18, %v2939_v27  ;;  %vm2855_vm1 = vmmov 0   ;;  %s2828_s28 = scalar_lea.vmem %s2190_s27, 128  ;;  %p2833_p1 = scmp.lt.s32.totalorder %s2190_s27, %s2190_s27 }
   0x9   :  { %2409 = vmatprep.subr.mxu0 %v2852_v13  ;;  %v140_v32 = vsub.f32 %v2923_v21, %v2942_v28  ;;  %v154_v33 = vsub.f32 %v2917_v19, %v2933_v25  ;;  %1644 = vperm.xlu1 %2826, %v12_v0   ;;  %v161_v38 = vsub.f32 %v2920_v20, %v2947_v30  ;;  %v2972_v39 = vand.u32 4294901760, %v2937_v26  ;;  %p2829_p0 = scmp.ne.s32.totalorder %s2190_s27, %s2828_s28  ;;  %p2834_p2 = scmp.lt.s32.totalorder %s2828_s28, %s2828_s28 }
   0xa   :  { %2410 = vmatpush3.msra.mxu0 %v2892_v9  ;;  %2436 = vmatprep.mubr.msk.f32.mxu1 %vm2855_vm1, %v2852_v13  ;;  %v2967_v37 = vand.u32 4294901760, %v147_v29  ;;  %v168_v41 = vsub.f32 %v2929_v23, %v2956_v34  ;;  %v2984_v42 = vand.u32 4294901760, %v2959_v35  ;;  %v20_v49 = vlaneseq }
   0xb   :  { %2411 = vmatprep.subr.mxu0 %v2852_v13  ;;  %v2965_v36 = vand.u32 4294901760, %v140_v32  ;;  %2419 = vmatprep.mubr.msk.f32.mxu0 %vm2855_vm1, %v2852_v13  ;;  %v2979_v40 = vand.u32 4294901760, %v154_v33  ;;  %v2990_v43 = vand.u32 4294901760, %v161_v38  ;;  %v175_v44 = vsub.f32 %v2937_v26, %v2972_v39  ;;  %p2835_p3 = por %p2834_p2, %p2833_p1 }
   0xc   :  { %2412 = vmatpush3.msra.mxu0 %v2894_v10  ;;  %2827 = vset.pattern.permute.xlu0 %v2854_v31  ;;  %v2998_v45 = vand.u32 4294901760, %v168_v41  ;;  %v182_v46 = vsub.f32 %v2959_v35, %v2984_v42  ;;  %v3017_v50 = vand.u32 127, %v20_v49  ;;  %vm28_vm2 = vcmask 408576  }
   0xd   :  { %2413 = vmatprep.subr.mxu0 %v2852_v13  ;;  %2423 = vmatpush3.msra.mxu1 %v2965_v36  ;;  %v3006_v47 = vand.u32 4294901760, %v175_v44  ;;  %vm561_vm7 = vcmask 261120   ;;  %vm1101_vm8 = vcmask 523520   ;;  %vm1641_vm9 = vcmask 785920   ;;  %p2836_p4 = pnand %p2835_p3, %p2829_p0 }
   0xe   :  { %2414 = vmatpush3.msra.mxu0 %v2909_v16  ;;  %2424 = vmatprep.subr.mxu1 %v2852_v13  ;;  %v3010_v48 = vand.u32 4294901760, %v182_v46  ;;  %vm2181_vm10 = vcmask 1048320  }
   0xf   :  { %2415 = vmatprep.subr.mxu0 %v2852_v13  ;;  %2425 = vmatpush3.msra.mxu1 %v2967_v37 }
  0x10   :  { %2416 = vmatpush3.msra.mxu0 %v2911_v17  ;;  %2426 = vmatprep.subr.mxu1 %v2852_v13 }
  0x11   :  { %2417 = vmatprep.subr.mxu0 %v2852_v13  ;;  %2427 = vmatpush3.msra.mxu1 %v2979_v40 }
  0x12   :  { %2418 = vmatpush3.msra.mxu0 %v2939_v27  ;;  %2428 = vmatprep.subr.mxu1 %v2852_v13 }
  0x13   :  { %2439 = vmatprep.subr.mxu0 %v2852_v13  ;;  %2429 = vmatpush3.msra.mxu1 %v2990_v43 }
  0x14   :  { %2430 = vmatprep.subr.mxu1 %v2852_v13 }
  0x15   :  { %2431 = vmatpush3.msra.mxu1 %v2998_v45 }
  0x16   :  { %2432 = vmatprep.subr.mxu1 %v2852_v13 }
  0x17   :  { %2433 = vmatpush3.msra.mxu1 %v3006_v47 }
  0x18   :  { %2434 = vmatprep.subr.mxu1 %v2852_v13 }
  0x19   :  { %2435 = vmatpush3.msra.mxu1 %v3010_v48 }
  0x1a   :  { %2456 = vmatprep.subr.mxu1 %v2852_v13 }
  0x7d   :  { %v24_v51 = vpop.permute.xlu0 %23  ;;  %v1105_v1 = vpop.permute.xlu1 %1104 }
  0x7e   :  { %vm25_vm3 = vcmp.eq.s32.totalorder %v24_v51, %v3017_v50  ;;  %vm1106_vm5 = vcmp.eq.s32.totalorder %v1105_v1, %v3017_v50 }
  0x7f   :  { %v3021_v52 = vsel %vm25_vm3, 1.0, %v2852_v13  ;;  %v3204_v2 = vsel %vm1106_vm5, 1.0, %v2852_v13 }
  0x80   :  { %v30_v53 = vsel %vm28_vm2, %v3021_v52, 0  ;;  %2437 = vmatmul.mubr.msk.f32.vlgmr.msra.gmra.mxu1 %vm28_vm2, %v3021_v52  ;;  %v1110_v3 = vsel %vm28_vm2, %v3204_v2, 0 }
  0x81   :  { %v109_v54 = vsub.f32 %v30_v53, %v30_v53  ;;  %2457 = vmatpush3.msra.mxu1 %v2903_v14  ;;  %2470 = vmatprep.mubr.msk.f32.mxu1 %vm2855_vm1, %v2852_v13  ;;  %v3222_v4 = vsub.f32 %v1110_v3, %v1110_v3 }
  0x82   :  { %2458 = vmatprep.subr.mxu1 %v2852_v13 }
  0x83   :  { %2459 = vmatpush3.msra.mxu1 %v2884_v5  ;;  %v110_v55 = vand.u32 4294901760, %v109_v54  ;;  %v565_v58 = vpop.permute.xlu0 %564  ;;  %v1186_v6 = vand.u32 4294901760, %v3222_v4 }
  0x84   :  { %2460 = vmatprep.subr.mxu1 %v2852_v13  ;;  %vm566_vm4 = vcmp.eq.s32.totalorder %v565_v58, %v3017_v50  ;;  %v1645_v11 = vpop.permute.xlu1 %1644 }
  0x85   :  { %2461 = vmatpush3.msra.mxu1 %v2892_v9  ;;  %v111_v56 = vsub.f32 %v109_v54, %v110_v55  ;;  %v3091_v59 = vsel %vm566_vm4, 1.0, %v2852_v13  ;;  %v1187_v7 = vsub.f32 %v3222_v4, %v1186_v6  ;;  %vm1646_vm6 = vcmp.eq.s32.totalorder %v1645_v11, %v3017_v50 }
  0x86   :  { %2462 = vmatprep.subr.mxu1 %v2852_v13  ;;  %v570_v60 = vsel %vm28_vm2, %v3091_v59, 0  ;;  %v3317_v12 = vsel %vm1646_vm6, 1.0, %v2852_v13 }
  0x87   :  { %2463 = vmatpush3.msra.mxu1 %v2894_v10  ;;  %v112_v57 = vand.u32 4294901760, %v111_v56  ;;  %v3109_v61 = vsub.f32 %v570_v60, %v570_v60  ;;  %v1188_v8 = vand.u32 4294901760, %v1187_v7  ;;  %v1650_v18 = vsel %vm28_vm2, %v3317_v12, 0 }
  0x88   :  { %2464 = vmatprep.subr.mxu1 %v2852_v13  ;;  %v3335_v24 = vsub.f32 %v1650_v18, %v1650_v18 }
  0x89   :  { %2465 = vmatpush3.msra.mxu1 %v2909_v16  ;;  %2420 = vmatmul.mubr.f32.vlgmr.msra.gmra.mxu0 %v112_v57  ;;  %v646_v62 = vand.u32 4294901760, %v3109_v61 }
  0x8a   :  { %2440 = vmatpush3.msra.mxu0 %v2923_v21  ;;  %2466 = vmatprep.subr.mxu1 %v2852_v13  ;;  %v1726_v29 = vand.u32 4294901760, %v3335_v24 }
  0x8b   :  { %2441 = vmatprep.subr.mxu0 %v2852_v13  ;;  %2467 = vmatpush3.msra.mxu1 %v2911_v17  ;;  %v647_v63 = vsub.f32 %v3109_v61, %v646_v62 }
  0x8c   :  { %2442 = vmatpush3.msra.mxu0 %v2906_v15  ;;  %2468 = vmatprep.subr.mxu1 %v2852_v13  ;;  %v1727_v31 = vsub.f32 %v3335_v24, %v1726_v29 }
  0x8d   :  { %2443 = vmatprep.subr.mxu0 %v2852_v13  ;;  %2469 = vmatpush3.msra.mxu1 %v2939_v27  ;;  %v648_v0 = vand.u32 4294901760, %v647_v63 }
  0x8e   :  { %2444 = vmatpush3.msra.mxu0 %v2917_v19  ;;  %2471 = vmatmul.mubr.f32.vlgmr.msra.gmra.mxu1 %v110_v55  ;;  %v1728_v32 = vand.u32 4294901760, %v1727_v31 }
  0x8f   :  { %2490 = vmatprep.subr.mxu1 %v2852_v13  ;;  %2445 = vmatprep.subr.mxu0 %v2852_v13 }
  0x90   :  { %2491 = vmatpush3.msra.mxu1 %v2903_v14  ;;  %2446 = vmatpush3.msra.mxu0 %v2920_v20 }
  0x91   :  { %2492 = vmatprep.subr.mxu1 %v2852_v13  ;;  %2447 = vmatprep.subr.mxu0 %v2852_v13 }
  0x92   :  { %2493 = vmatpush3.msra.mxu1 %v2884_v5  ;;  %2448 = vmatpush3.msra.mxu0 %v2929_v23 }
  0x93   :  { %2494 = vmatprep.subr.mxu1 %v2852_v13  ;;  %2449 = vmatprep.subr.mxu0 %v2852_v13 }
  0x94   :  { %2495 = vmatpush3.msra.mxu1 %v2892_v9  ;;  %2450 = vmatpush3.msra.mxu0 %v2937_v26 }
  0x95   :  { %2496 = vmatprep.subr.mxu1 %v2852_v13  ;;  %2451 = vmatprep.subr.mxu0 %v2852_v13 }
  0x96   :  { %2497 = vmatpush3.msra.mxu1 %v2894_v10  ;;  %2452 = vmatpush3.msra.mxu0 %v2959_v35 }
  0x97   :  { %2453 = vmatprep.mubr.msk.f32.mxu0 %vm2855_vm1, %v2852_v13  ;;  %2498 = vmatprep.subr.mxu1 %v2852_v13 }
  0x98   :  { %2454 = vmatmul.mubr.f32.vlgmr.msra.gmra.mxu0 %v109_v54  ;;  %2473 = vmatprep.subr.mxu0 %v2852_v13 }
  0x99   :  { %2499 = vmatpush3.msra.mxu1 %v2909_v16  ;;  %2474 = vmatpush3.msra.mxu0 %v2942_v28 }
  0x9a   :  { %2500 = vmatprep.subr.mxu1 %v2852_v13  ;;  %2475 = vmatprep.subr.mxu0 %v2852_v13 }
  0x9b   :  { %2501 = vmatpush3.msra.mxu1 %v2911_v17  ;;  %2476 = vmatpush3.msra.mxu0 %v2926_v22 }
  0x9c   :  { %2502 = vmatprep.subr.mxu1 %v2852_v13  ;;  %2477 = vmatprep.subr.mxu0 %v2852_v13 }
  0x9d   :  { %2503 = vmatpush3.msra.mxu1 %v2939_v27  ;;  %2504 = vmatprep.mubr.msk.f32.mxu1 %vm2855_vm1, %v2852_v13 }
  0x9e   :  { %2478 = vmatpush3.msra.mxu0 %v2933_v25  ;;  %2505 = vmatmul.mubr.msk.f32.vlgmr.msra.gmra.mxu1 %vm28_vm2, %v3021_v52 }
  0x9f   :  { %2524 = vmatprep.subr.mxu1 %v2852_v13  ;;  %2479 = vmatprep.subr.mxu0 %v2852_v13 }
  0xa0   :  { %2525 = vmatpush3.msra.mxu1 %v2965_v36  ;;  %2480 = vmatpush3.msra.mxu0 %v2947_v30 }
  0xa1   :  { %2526 = vmatprep.subr.mxu1 %v2852_v13  ;;  %2481 = vmatprep.subr.mxu0 %v2852_v13 }
  0xa2   :  { %2527 = vmatpush3.msra.mxu1 %v2967_v37  ;;  %2482 = vmatpush3.msra.mxu0 %v2956_v34 }
  0xa3   :  { %2528 = vmatprep.subr.mxu1 %v2852_v13  ;;  %2483 = vmatprep.subr.mxu0 %v2852_v13 }
  0xa4   :  { %2529 = vmatpush3.msra.mxu1 %v2979_v40  ;;  %2484 = vmatpush3.msra.mxu0 %v2972_v39 }
  0xa5   :  { %2530 = vmatprep.subr.mxu1 %v2852_v13  ;;  %2485 = vmatprep.subr.mxu0 %v2852_v13 }
  0xa6   :  { %2531 = vmatpush3.msra.mxu1 %v2990_v43  ;;  %2486 = vmatpush3.msra.mxu0 %v2984_v42 }
  0xa7   :  { %2487 = vmatprep.mubr.msk.f32.mxu0 %vm2855_vm1, %v2852_v13  ;;  %2532 = vmatprep.subr.mxu1 %v2852_v13 }
  0xa8   :  { %2488 = vmatmul.mubr.msk.f32.vlgmr.msra.gmra.mxu0 %vm28_vm2, %v3021_v52  ;;  %2507 = vmatprep.subr.mxu0 %v2852_v13 }
  0xa9   :  { %2533 = vmatpush3.msra.mxu1 %v2998_v45  ;;  %2508 = vmatpush3.msra.mxu0 %v2903_v14 }
  0xaa   :  { %2534 = vmatprep.subr.mxu1 %v2852_v13  ;;  %2509 = vmatprep.subr.mxu0 %v2852_v13 }
  0xab   :  { %2535 = vmatpush3.msra.mxu1 %v3006_v47  ;;  %2510 = vmatpush3.msra.mxu0 %v2884_v5 }
  0xac   :  { %2536 = vmatprep.subr.mxu1 %v2852_v13  ;;  %2511 = vmatprep.subr.mxu0 %v2852_v13 }
  0xad   :  { %2537 = vmatpush3.msra.mxu1 %v3010_v48  ;;  %2538 = vmatprep.mubr.msk.f32.mxu1 %vm2855_vm1, %v2852_v13 }
  0xae   :  { %2512 = vmatpush3.msra.mxu0 %v2892_v9  ;;  %2539 = vmatmul.mubr.msk.f32.vlgmr.msra.gmra.mxu1 %vm28_vm2, %v3091_v59 }
  0xaf   :  { %2558 = vmatprep.subr.mxu1 %v2852_v13  ;;  %2513 = vmatprep.subr.mxu0 %v2852_v13 }
  0xb0   :  { %2559 = vmatpush3.msra.mxu1 %v2903_v14  ;;  %2514 = vmatpush3.msra.mxu0 %v2894_v10 }
  0xb1   :  { %2560 = vmatprep.subr.mxu1 %v2852_v13  ;;  %2515 = vmatprep.subr.mxu0 %v2852_v13 }
  0xb2   :  { %2561 = vmatpush3.msra.mxu1 %v2884_v5  ;;  %2516 = vmatpush3.msra.mxu0 %v2909_v16 }
  0xb3   :  { %2562 = vmatprep.subr.mxu1 %v2852_v13  ;;  %2517 = vmatprep.subr.mxu0 %v2852_v13 }
  0xb4   :  { %2563 = vmatpush3.msra.mxu1 %v2892_v9  ;;  %2518 = vmatpush3.msra.mxu0 %v2911_v17 }
  0xb5   :  { %2564 = vmatprep.subr.mxu1 %v2852_v13  ;;  %2519 = vmatprep.subr.mxu0 %v2852_v13 }
  0xb6   :  { %2565 = vmatpush3.msra.mxu1 %v2894_v10  ;;  %2520 = vmatpush3.msra.mxu0 %v2939_v27 }
  0xb7   :  { %2521 = vmatprep.mubr.msk.f32.mxu0 %vm2855_vm1, %v2852_v13  ;;  %2566 = vmatprep.subr.mxu1 %v2852_v13 }
  0xb8   :  { %2522 = vmatmul.mubr.f32.vlgmr.msra.gmra.mxu0 %v648_v0  ;;  %2541 = vmatprep.subr.mxu0 %v2852_v13 }
  0xb9   :  { %2567 = vmatpush3.msra.mxu1 %v2909_v16  ;;  %2542 = vmatpush3.msra.mxu0 %v2923_v21 }
  0xba   :  { %2568 = vmatprep.subr.mxu1 %v2852_v13  ;;  %2543 = vmatprep.subr.mxu0 %v2852_v13 }
  0xbb   :  { %2569 = vmatpush3.msra.mxu1 %v2911_v17  ;;  %2544 = vmatpush3.msra.mxu0 %v2906_v15 }
  0xbc   :  { %2570 = vmatprep.subr.mxu1 %v2852_v13  ;;  %2545 = vmatprep.subr.mxu0 %v2852_v13 }
  0xbd   :  { %2571 = vmatpush3.msra.mxu1 %v2939_v27  ;;  %2572 = vmatprep.mubr.msk.f32.mxu1 %vm2855_vm1, %v2852_v13 }
  0xbe   :  { %2546 = vmatpush3.msra.mxu0 %v2917_v19  ;;  %2573 = vmatmul.mubr.f32.vlgmr.msra.gmra.mxu1 %v646_v62 }
  0xbf   :  { %2592 = vmatprep.subr.mxu1 %v2852_v13  ;;  %2547 = vmatprep.subr.mxu0 %v2852_v13 }
  0xc0   :  { %2593 = vmatpush3.msra.mxu1 %v2903_v14  ;;  %2548 = vmatpush3.msra.mxu0 %v2920_v20 }
  0xc1   :  { %2594 = vmatprep.subr.mxu1 %v2852_v13  ;;  %2549 = vmatprep.subr.mxu0 %v2852_v13 }
  0xc2   :  { %2595 = vmatpush3.msra.mxu1 %v2884_v5  ;;  %2550 = vmatpush3.msra.mxu0 %v2929_v23 }
  0xc3   :  { %2596 = vmatprep.subr.mxu1 %v2852_v13  ;;  %2551 = vmatprep.subr.mxu0 %v2852_v13 }
  0xc4   :  { %2597 = vmatpush3.msra.mxu1 %v2892_v9  ;;  %2552 = vmatpush3.msra.mxu0 %v2937_v26 }
  0xc5   :  { %2598 = vmatprep.subr.mxu1 %v2852_v13  ;;  %2553 = vmatprep.subr.mxu0 %v2852_v13 }
  0xc6   :  { %2599 = vmatpush3.msra.mxu1 %v2894_v10  ;;  %2554 = vmatpush3.msra.mxu0 %v2959_v35 }
  0xc7   :  { %2555 = vmatprep.mubr.msk.f32.mxu0 %vm2855_vm1, %v2852_v13  ;;  %2600 = vmatprep.subr.mxu1 %v2852_v13 }
  0xc8   :  { %2556 = vmatmul.mubr.f32.vlgmr.msra.gmra.mxu0 %v3109_v61  ;;  %2575 = vmatprep.subr.mxu0 %v2852_v13 }
  0xc9   :  { %2601 = vmatpush3.msra.mxu1 %v2909_v16  ;;  %2576 = vmatpush3.msra.mxu0 %v2942_v28 }
  0xca   :  { %2602 = vmatprep.subr.mxu1 %v2852_v13  ;;  %2577 = vmatprep.subr.mxu0 %v2852_v13 }
  0xcb   :  { %2603 = vmatpush3.msra.mxu1 %v2911_v17  ;;  %2578 = vmatpush3.msra.mxu0 %v2926_v22 }
  0xcc   :  { %2604 = vmatprep.subr.mxu1 %v2852_v13  ;;  %2579 = vmatprep.subr.mxu0 %v2852_v13 }
  0xcd   :  { %2605 = vmatpush3.msra.mxu1 %v2939_v27  ;;  %2606 = vmatprep.mubr.msk.f32.mxu1 %vm2855_vm1, %v2852_v13 }
  0xce   :  { %2580 = vmatpush3.msra.mxu0 %v2933_v25  ;;  %2607 = vmatmul.mubr.msk.f32.vlgmr.msra.gmra.mxu1 %vm28_vm2, %v3091_v59 }
  0xcf   :  { %2626 = vmatprep.subr.mxu1 %v2852_v13  ;;  %2581 = vmatprep.subr.mxu0 %v2852_v13 }
  0xd0   :  { %2627 = vmatpush3.msra.mxu1 %v2965_v36  ;;  %2582 = vmatpush3.msra.mxu0 %v2947_v30 }
  0xd1   :  { %2628 = vmatprep.subr.mxu1 %v2852_v13  ;;  %2583 = vmatprep.subr.mxu0 %v2852_v13 }
  0xd2   :  { %2629 = vmatpush3.msra.mxu1 %v2967_v37  ;;  %2584 = vmatpush3.msra.mxu0 %v2956_v34 }
  0xd3   :  { %2630 = vmatprep.subr.mxu1 %v2852_v13  ;;  %2585 = vmatprep.subr.mxu0 %v2852_v13 }
  0xd4   :  { %2631 = vmatpush3.msra.mxu1 %v2979_v40  ;;  %2586 = vmatpush3.msra.mxu0 %v2972_v39 }
  0xd5   :  { %2632 = vmatprep.subr.mxu1 %v2852_v13  ;;  %2587 = vmatprep.subr.mxu0 %v2852_v13 }
  0xd6   :  { %2633 = vmatpush3.msra.mxu1 %v2990_v43  ;;  %2588 = vmatpush3.msra.mxu0 %v2984_v42 }
  0xd7   :  { %2589 = vmatprep.mubr.msk.f32.mxu0 %vm2855_vm1, %v2852_v13  ;;  %2634 = vmatprep.subr.mxu1 %v2852_v13 }
  0xd8   :  { %2590 = vmatmul.mubr.msk.f32.vlgmr.msra.gmra.mxu0 %vm28_vm2, %v3091_v59  ;;  %2609 = vmatprep.subr.mxu0 %v2852_v13 }
  0xd9   :  { %2635 = vmatpush3.msra.mxu1 %v2998_v45  ;;  %2610 = vmatpush3.msra.mxu0 %v2903_v14 }
  0xda   :  { %2636 = vmatprep.subr.mxu1 %v2852_v13  ;;  %2611 = vmatprep.subr.mxu0 %v2852_v13 }
  0xdb   :  { %2637 = vmatpush3.msra.mxu1 %v3006_v47  ;;  %2612 = vmatpush3.msra.mxu0 %v2884_v5 }
  0xdc   :  { %2638 = vmatprep.subr.mxu1 %v2852_v13  ;;  %2613 = vmatprep.subr.mxu0 %v2852_v13 }
  0xdd   :  { %2639 = vmatpush3.msra.mxu1 %v3010_v48  ;;  %2640 = vmatprep.mubr.msk.f32.mxu1 %vm2855_vm1, %v2852_v13 }
  0xde   :  { %2614 = vmatpush3.msra.mxu0 %v2892_v9  ;;  %2641 = vmatmul.mubr.msk.f32.vlgmr.msra.gmra.mxu1 %vm28_vm2, %v3204_v2 }
  0xdf   :  { %2660 = vmatprep.subr.mxu1 %v2852_v13  ;;  %2615 = vmatprep.subr.mxu0 %v2852_v13 }
  0xe0   :  { %2661 = vmatpush3.msra.mxu1 %v2903_v14  ;;  %2616 = vmatpush3.msra.mxu0 %v2894_v10 }
  0xe1   :  { %2662 = vmatprep.subr.mxu1 %v2852_v13  ;;  %2617 = vmatprep.subr.mxu0 %v2852_v13 }
  0xe2   :  { %2663 = vmatpush3.msra.mxu1 %v2884_v5  ;;  %2618 = vmatpush3.msra.mxu0 %v2909_v16 }
  0xe3   :  { %2664 = vmatprep.subr.mxu1 %v2852_v13  ;;  %2619 = vmatprep.subr.mxu0 %v2852_v13 }
  0xe4   :  { %2665 = vmatpush3.msra.mxu1 %v2892_v9  ;;  %2620 = vmatpush3.msra.mxu0 %v2911_v17 }
  0xe5   :  { %2666 = vmatprep.subr.mxu1 %v2852_v13  ;;  %2621 = vmatprep.subr.mxu0 %v2852_v13 }
  0xe6   :  { %2667 = vmatpush3.msra.mxu1 %v2894_v10  ;;  %2622 = vmatpush3.msra.mxu0 %v2939_v27 }
  0xe7   :  { %2623 = vmatprep.mubr.msk.f32.mxu0 %vm2855_vm1, %v2852_v13  ;;  %2668 = vmatprep.subr.mxu1 %v2852_v13 }
  0xe8   :  { %2624 = vmatmul.mubr.f32.vlgmr.msra.gmra.mxu0 %v1188_v8  ;;  %2643 = vmatprep.subr.mxu0 %v2852_v13 }
  0xe9   :  { %2669 = vmatpush3.msra.mxu1 %v2909_v16  ;;  %2644 = vmatpush3.msra.mxu0 %v2923_v21 }
  0xea   :  { %2670 = vmatprep.subr.mxu1 %v2852_v13  ;;  %2645 = vmatprep.subr.mxu0 %v2852_v13 }
  0xeb   :  { %2671 = vmatpush3.msra.mxu1 %v2911_v17  ;;  %2646 = vmatpush3.msra.mxu0 %v2906_v15 }
  0xec   :  { %2672 = vmatprep.subr.mxu1 %v2852_v13  ;;  %2647 = vmatprep.subr.mxu0 %v2852_v13 }
  0xed   :  { %2673 = vmatpush3.msra.mxu1 %v2939_v27  ;;  %2674 = vmatprep.mubr.msk.f32.mxu1 %vm2855_vm1, %v2852_v13 }
  0xee   :  { %2648 = vmatpush3.msra.mxu0 %v2917_v19  ;;  %2675 = vmatmul.mubr.f32.vlgmr.msra.gmra.mxu1 %v1186_v6 }
  0xef   :  { %2694 = vmatprep.subr.mxu1 %v2852_v13  ;;  %2649 = vmatprep.subr.mxu0 %v2852_v13 }
  0xf0   :  { %2695 = vmatpush3.msra.mxu1 %v2903_v14  ;;  %2650 = vmatpush3.msra.mxu0 %v2920_v20 }
  0xf1   :  { %2696 = vmatprep.subr.mxu1 %v2852_v13  ;;  %2651 = vmatprep.subr.mxu0 %v2852_v13 }
  0xf2   :  { %2697 = vmatpush3.msra.mxu1 %v2884_v5  ;;  %2652 = vmatpush3.msra.mxu0 %v2929_v23 }
  0xf3   :  { %2698 = vmatprep.subr.mxu1 %v2852_v13  ;;  %2653 = vmatprep.subr.mxu0 %v2852_v13 }
  0xf4   :  { %2699 = vmatpush3.msra.mxu1 %v2892_v9  ;;  %2654 = vmatpush3.msra.mxu0 %v2937_v26 }
  0xf5   :  { %2700 = vmatprep.subr.mxu1 %v2852_v13  ;;  %2655 = vmatprep.subr.mxu0 %v2852_v13 }
  0xf6   :  { %2701 = vmatpush3.msra.mxu1 %v2894_v10  ;;  %2656 = vmatpush3.msra.mxu0 %v2959_v35 }
  0xf7   :  { %2657 = vmatprep.mubr.msk.f32.mxu0 %vm2855_vm1, %v2852_v13  ;;  %2702 = vmatprep.subr.mxu1 %v2852_v13 }
  0xf8   :  { %2658 = vmatmul.mubr.f32.vlgmr.msra.gmra.mxu0 %v3222_v4  ;;  %2677 = vmatprep.subr.mxu0 %v2852_v13 }
  0xf9   :  { %2703 = vmatpush3.msra.mxu1 %v2909_v16  ;;  %2678 = vmatpush3.msra.mxu0 %v2942_v28 }
  0xfa   :  { %2704 = vmatprep.subr.mxu1 %v2852_v13  ;;  %2679 = vmatprep.subr.mxu0 %v2852_v13 }
  0xfb   :  { %2705 = vmatpush3.msra.mxu1 %v2911_v17  ;;  %2680 = vmatpush3.msra.mxu0 %v2926_v22 }
  0xfc   :  { %2706 = vmatprep.subr.mxu1 %v2852_v13  ;;  %2681 = vmatprep.subr.mxu0 %v2852_v13 }
  0xfd   :  { %2707 = vmatpush3.msra.mxu1 %v2939_v27  ;;  %2708 = vmatprep.mubr.msk.f32.mxu1 %vm2855_vm1, %v2852_v13 }
  0xfe   :  { %2682 = vmatpush3.msra.mxu0 %v2933_v25  ;;  %2709 = vmatmul.mubr.msk.f32.vlgmr.msra.gmra.mxu1 %vm28_vm2, %v3204_v2 }
  0xff   :  { %2728 = vmatprep.subr.mxu1 %v2852_v13  ;;  %2683 = vmatprep.subr.mxu0 %v2852_v13 }
 0x100   :  { %2729 = vmatpush3.msra.mxu1 %v2965_v36  ;;  %2684 = vmatpush3.msra.mxu0 %v2947_v30 }
 0x101   :  { %2730 = vmatprep.subr.mxu1 %v2852_v13  ;;  %2685 = vmatprep.subr.mxu0 %v2852_v13 }
 0x102   :  { %2731 = vmatpush3.msra.mxu1 %v2967_v37  ;;  %2686 = vmatpush3.msra.mxu0 %v2956_v34 }
 0x103   :  { %2732 = vmatprep.subr.mxu1 %v2852_v13  ;;  %2687 = vmatprep.subr.mxu0 %v2852_v13 }
 0x104   :  { %2733 = vmatpush3.msra.mxu1 %v2979_v40  ;;  %2688 = vmatpush3.msra.mxu0 %v2972_v39 }
 0x105   :  { %2734 = vmatprep.subr.mxu1 %v2852_v13  ;;  %2689 = vmatprep.subr.mxu0 %v2852_v13 }
 0x106   :  { %2735 = vmatpush3.msra.mxu1 %v2990_v43  ;;  %2690 = vmatpush3.msra.mxu0 %v2984_v42 }
 0x107   :  { %2691 = vmatprep.mubr.msk.f32.mxu0 %vm2855_vm1, %v2852_v13  ;;  %2736 = vmatprep.subr.mxu1 %v2852_v13 }
 0x108   :  { %2692 = vmatmul.mubr.msk.f32.vlgmr.msra.gmra.mxu0 %vm28_vm2, %v3204_v2  ;;  %2711 = vmatprep.subr.mxu0 %v2852_v13 }
 0x109   :  { %2737 = vmatpush3.msra.mxu1 %v2998_v45  ;;  %2712 = vmatpush3.msra.mxu0 %v2903_v14 }
 0x10a   :  { %2738 = vmatprep.subr.mxu1 %v2852_v13  ;;  %2713 = vmatprep.subr.mxu0 %v2852_v13 }
 0x10b   :  { %2739 = vmatpush3.msra.mxu1 %v3006_v47  ;;  %2714 = vmatpush3.msra.mxu0 %v2884_v5 }
 0x10c   :  { %2740 = vmatprep.subr.mxu1 %v2852_v13  ;;  %2715 = vmatprep.subr.mxu0 %v2852_v13 }
 0x10d   :  { %2741 = vmatpush3.msra.mxu1 %v3010_v48  ;;  %2742 = vmatprep.mubr.msk.f32.mxu1 %vm2855_vm1, %v2852_v13 }
 0x10e   :  { %2716 = vmatpush3.msra.mxu0 %v2892_v9  ;;  %2743 = vmatmul.mubr.msk.f32.vlgmr.msra.gmra.mxu1 %vm28_vm2, %v3317_v12 }
 0x10f   :  { %2762 = vmatprep.subr.mxu1 %v2852_v13  ;;  %2717 = vmatprep.subr.mxu0 %v2852_v13 }
 0x110   :  { %2763 = vmatpush3.msra.mxu1 %v2903_v14  ;;  %2718 = vmatpush3.msra.mxu0 %v2894_v10 }
 0x111   :  { %2764 = vmatprep.subr.mxu1 %v2852_v13  ;;  %2719 = vmatprep.subr.mxu0 %v2852_v13 }
 0x112   :  { %2765 = vmatpush3.msra.mxu1 %v2884_v5  ;;  %2720 = vmatpush3.msra.mxu0 %v2909_v16 }
 0x113   :  { %2766 = vmatprep.subr.mxu1 %v2852_v13  ;;  %2721 = vmatprep.subr.mxu0 %v2852_v13 }
 0x114   :  { %2767 = vmatpush3.msra.mxu1 %v2892_v9  ;;  %2722 = vmatpush3.msra.mxu0 %v2911_v17 }
 0x115   :  { %2768 = vmatprep.subr.mxu1 %v2852_v13  ;;  %2723 = vmatprep.subr.mxu0 %v2852_v13 }
 0x116   :  { %2769 = vmatpush3.msra.mxu1 %v2894_v10  ;;  %2724 = vmatpush3.msra.mxu0 %v2939_v27 }
 0x117   :  { %2725 = vmatprep.mubr.msk.f32.mxu0 %vm2855_vm1, %v2852_v13  ;;  %2770 = vmatprep.subr.mxu1 %v2852_v13 }
 0x118   :  { %2726 = vmatmul.mubr.f32.vlgmr.msra.gmra.mxu0 %v1728_v32  ;;  %2745 = vmatprep.subr.mxu0 %v2852_v13 }
 0x119   :  { %2771 = vmatpush3.msra.mxu1 %v2909_v16  ;;  %2746 = vmatpush3.msra.mxu0 %v2923_v21 }
 0x11a   :  { %2772 = vmatprep.subr.mxu1 %v2852_v13  ;;  %2747 = vmatprep.subr.mxu0 %v2852_v13 }
 0x11b   :  { %2773 = vmatpush3.msra.mxu1 %v2911_v17  ;;  %2748 = vmatpush3.msra.mxu0 %v2906_v15 }
 0x11c   :  { %2774 = vmatprep.subr.mxu1 %v2852_v13  ;;  %2749 = vmatprep.subr.mxu0 %v2852_v13 }
 0x11d   :  { %2775 = vmatpush3.msra.mxu1 %v2939_v27  ;;  %2776 = vmatprep.mubr.msk.f32.mxu1 %vm2855_vm1, %v2852_v13 }
 0x11e   :  { %2750 = vmatpush3.msra.mxu0 %v2917_v19  ;;  %2777 = vmatmul.mubr.f32.vlgmr.msra.gmra.mxu1 %v1726_v29 }
 0x11f   :  { %2796 = vmatprep.subr.mxu1 %v2852_v13  ;;  %2751 = vmatprep.subr.mxu0 %v2852_v13 }
 0x120   :  { %2797 = vmatpush3.msra.mxu1 %v2903_v14  ;;  %2752 = vmatpush3.msra.mxu0 %v2920_v20 }
 0x121   :  { %2798 = vmatprep.subr.mxu1 %v2852_v13  ;;  %2753 = vmatprep.subr.mxu0 %v2852_v13 }
 0x122   :  { %2799 = vmatpush3.msra.mxu1 %v2884_v5  ;;  %2754 = vmatpush3.msra.mxu0 %v2929_v23 }
 0x123   :  { %2800 = vmatprep.subr.mxu1 %v2852_v13  ;;  %2755 = vmatprep.subr.mxu0 %v2852_v13 }
 0x124   :  { %2801 = vmatpush3.msra.mxu1 %v2892_v9  ;;  %2756 = vmatpush3.msra.mxu0 %v2937_v26 }
 0x125   :  { %2802 = vmatprep.subr.mxu1 %v2852_v13  ;;  %2757 = vmatprep.subr.mxu0 %v2852_v13 }
 0x126   :  { %2803 = vmatpush3.msra.mxu1 %v2894_v10  ;;  %2758 = vmatpush3.msra.mxu0 %v2959_v35 }
 0x127   :  { %2759 = vmatprep.mubr.msk.f32.mxu0 %vm2855_vm1, %v2852_v13  ;;  %2804 = vmatprep.subr.mxu1 %v2852_v13 }
 0x128   :  { %2760 = vmatmul.mubr.f32.vlgmr.msra.gmra.mxu0 %v3335_v24  ;;  %2779 = vmatprep.subr.mxu0 %v2852_v13 }
 0x129   :  { %2805 = vmatpush3.msra.mxu1 %v2909_v16  ;;  %2780 = vmatpush3.msra.mxu0 %v2942_v28 }
 0x12a   :  { %2806 = vmatprep.subr.mxu1 %v2852_v13  ;;  %2781 = vmatprep.subr.mxu0 %v2852_v13 }
 0x12b   :  { %2807 = vmatpush3.msra.mxu1 %v2911_v17  ;;  %2782 = vmatpush3.msra.mxu0 %v2926_v22 }
 0x12c   :  { %2808 = vmatprep.subr.mxu1 %v2852_v13  ;;  %2783 = vmatprep.subr.mxu0 %v2852_v13 }
 0x12d   :  { %2809 = vmatpush3.msra.mxu1 %v2939_v27  ;;  %2810 = vmatprep.mubr.msk.f32.mxu1 %vm2855_vm1, %v2852_v13 }
 0x12e   :  { %2784 = vmatpush3.msra.mxu0 %v2933_v25  ;;  %2811 = vmatmul.mubr.msk.f32.vlgmr.msra.gmra.mxu1 %vm28_vm2, %v3317_v12 }
 0x12f   :  { %2785 = vmatprep.subr.mxu0 %v2852_v13  ;;  %2793 = vmatprep.mubr.msk.f32.mxu0 %vm2855_vm1, %v2852_v13 }
 0x130   :  { %2786 = vmatpush3.msra.mxu0 %v2947_v30 }
 0x131   :  { %2787 = vmatprep.subr.mxu0 %v2852_v13 }
 0x132   :  { %2788 = vmatpush3.msra.mxu0 %v2956_v34 }
 0x133   :  { %2789 = vmatprep.subr.mxu0 %v2852_v13 }
 0x134   :  { %2790 = vmatpush3.msra.mxu0 %v2972_v39 }
 0x135   :  { %2791 = vmatprep.subr.mxu0 %v2852_v13 }
 0x136   :  { %2792 = vmatpush3.msra.mxu0 %v2984_v42 }
 0x137   :  { %2794 = vmatmul.mubr.msk.f32.vlgmr.msra.gmra.mxu0 %vm28_vm2, %v3317_v12 }
 0x140   :  { %v220_v5 = vpop.f32.mrf.mxu1 }
 0x142   :  { %v2438_v9 = vpop.f32.mrf.mxu1 }
 0x149   :  { %v114_v10 = vpop.f32.mrf.mxu0 }
 0x14a   :  { %v221_v22 = vadd.f32 %v220_v5, %v114_v10 }
 0x14b   :  { %v2421_v14 = vpop.f32.mrf.mxu0 }
 0x14e   :  { %v386_v15 = vpop.f32.mrf.mxu1 }
 0x150   :  { %v2472_v16 = vpop.f32.mrf.mxu1 }
 0x158   :  { %v306_v17 = vpop.f32.mrf.mxu0 }
 0x159   :  { %v307_v23 = vadd.f32 %v306_v17, %v221_v22 }
 0x15a   :  { %v2455_v19 = vpop.f32.mrf.mxu0 }
 0x15b   :  { %v387_v25 = vadd.f32 %v386_v15, %v307_v23 }
 0x15e   :  { %v556_v20 = vpop.f32.mrf.mxu1 }
 0x160   :  { %v2506_v21 = vpop.f32.mrf.mxu1 }
 0x168   :  { %v478_v26 = vpop.f32.mrf.mxu0 }
 0x169   :  { %v479_v13 = vadd.f32 %v478_v26, %v387_v25 }
 0x16a   :  { %v2489_v27 = vpop.f32.mrf.mxu0 }
 0x16b   :  { %v557_v28 = vadd.f32 %v556_v20, %v479_v13 }
 0x16d   :  { %v560_v30 = vmul.f32 5.656854, %v557_v28 }
 0x16e   :  { %v756_v33 = vpop.f32.mrf.mxu1 }
 0x16f   :  { %562 = vst.msk [vmem:[#allocation2] sm:$0xff] %vm561_vm7, %v560_v30 }
 0x170   :  { %v2540_v34 = vpop.f32.mrf.mxu1 }
 0x178   :  { %v650_v35 = vpop.f32.mrf.mxu0 }
 0x179   :  { %v757_v43 = vadd.f32 %v756_v33, %v650_v35 }
 0x17a   :  { %v2523_v36 = vpop.f32.mrf.mxu0 }
 0x17e   :  { %v922_v37 = vpop.f32.mrf.mxu1 }
 0x180   :  { %v2574_v38 = vpop.f32.mrf.mxu1 }
 0x188   :  { %v842_v39 = vpop.f32.mrf.mxu0 }
 0x189   :  { %v843_v44 = vadd.f32 %v842_v39, %v757_v43 }
 0x18a   :  { %v2557_v40 = vpop.f32.mrf.mxu0 }
 0x18b   :  { %v923_v45 = vadd.f32 %v922_v37, %v843_v44 }
 0x18e   :  { %v1092_v41 = vpop.f32.mrf.mxu1 }
 0x190   :  { %v2608_v42 = vpop.f32.mrf.mxu1 }
 0x198   :  { %v1014_v46 = vpop.f32.mrf.mxu0 }
 0x199   :  { %v1015_v47 = vadd.f32 %v1014_v46, %v923_v45 }
 0x19a   :  { %v2591_v48 = vpop.f32.mrf.mxu0 }
 0x19b   :  { %v1093_v49 = vadd.f32 %v1092_v41, %v1015_v47 }
 0x19d   :  { %v1096_v50 = vmul.f32 5.656854, %v1093_v49 }
 0x19e   :  { %v1296_v51 = vpop.f32.mrf.mxu1 }
 0x19f   :  { %1098 = vrot.lane.b32.xlu1 %v1096_v50, %s2856_s1 }
 0x1a0   :  { %v2642_v52 = vpop.f32.mrf.mxu1 }
 0x1a8   :  { %v1190_v53 = vpop.f32.mrf.mxu0 }
 0x1a9   :  { %v1297_v61 = vadd.f32 %v1296_v51, %v1190_v53 }
 0x1aa   :  { %v2625_v54 = vpop.f32.mrf.mxu0 }
 0x1ae   :  { %v1462_v55 = vpop.f32.mrf.mxu1 }
 0x1b0   :  { %v2676_v56 = vpop.f32.mrf.mxu1 }
 0x1b8   :  { %v1382_v57 = vpop.f32.mrf.mxu0 }
 0x1b9   :  { %v1383_v62 = vadd.f32 %v1382_v57, %v1297_v61 }
 0x1ba   :  { %v2659_v58 = vpop.f32.mrf.mxu0 }
 0x1bb   :  { %v1463_v63 = vadd.f32 %v1462_v55, %v1383_v62 }
 0x1be   :  { %v1632_v59 = vpop.f32.mrf.mxu1 }
 0x1c0   :  { %v2710_v60 = vpop.f32.mrf.mxu1 }
 0x1c8   :  { %v1554_v0 = vpop.f32.mrf.mxu0 }
 0x1c9   :  { %v1555_v1 = vadd.f32 %v1554_v0, %v1463_v63 }
 0x1ca   :  { %v2693_v2 = vpop.f32.mrf.mxu0 }
 0x1cb   :  { %v1633_v3 = vadd.f32 %v1632_v59, %v1555_v1 }
 0x1cd   :  { %v1636_v4 = vmul.f32 5.656854, %v1633_v3 }
 0x1ce   :  { %v1836_v6 = vpop.f32.mrf.mxu1 }
 0x1cf   :  { %1638 = vrot.lane.b32.xlu0 %v1636_v4, %s2857_s24 }
 0x1d0   :  { %v2744_v7 = vpop.f32.mrf.mxu1 }
 0x1d8   :  { %v1730_v8 = vpop.f32.mrf.mxu0 }
 0x1d9   :  { %v1837_v32 = vadd.f32 %v1836_v6, %v1730_v8 }
 0x1da   :  { %v2727_v11 = vpop.f32.mrf.mxu0 }
 0x1de   :  { %v2002_v12 = vpop.f32.mrf.mxu1 }
 0x1e0   :  { %v2778_v18 = vpop.f32.mrf.mxu1 }
 0x1e8   :  { %v1922_v24 = vpop.f32.mrf.mxu0 }
 0x1e9   :  { %v1923_v9 = vadd.f32 %v1922_v24, %v1837_v32 }
 0x1ea   :  { %v2761_v29 = vpop.f32.mrf.mxu0 }
 0x1eb   :  { %v2003_v10 = vadd.f32 %v2002_v12, %v1923_v9 }
 0x1ee   :  { %v2172_v31 = vpop.f32.mrf.mxu1 }
 0x1f0   :  { %v2812_v5 = vpop.f32.mrf.mxu1 }
 0x1f7   :  { %v2094_v14 = vpop.f32.mrf.mxu0 }
 0x1f8   :  { %v2095_v15 = vadd.f32 %v2094_v14, %v2003_v10 }
 0x1f9   :  { %v2795_v16 = vpop.f32.mrf.mxu0 }
 0x1fa   :  { %v2173_v17 = vadd.f32 %v2172_v31, %v2095_v15 }
 0x1fc   :  { %v2176_v19 = vmul.f32 5.656854, %v2173_v17 }
 0x1fe   :  { %2178 = vrot.lane.b32.xlu1 %v2176_v19, %s2858_s25 }
 0x211   :  { %v1099_v20 = vpop.permute.xlu1 %1098 }
 0x212   :  { %1102 = vst.msk [vmem:[#allocation2] sm:$0xff] %vm1101_vm8, %v1099_v20 }
 0x241   :  { %v1639_v21 = vpop.permute.xlu0 %1638 }
 0x242   :  { %1642 = vst.msk [vmem:[#allocation2] sm:$0xff] %vm1641_vm9, %v1639_v21 }
 0x270   :  { %v2179_v22 = vpop.permute.xlu1 %2178 }
 0x271   :  { %2182 = vst.msk [vmem:[#allocation2] sm:$0xff] %vm2181_vm10, %v2179_v22 }
 0x272   :  { %2839 = shalt.err (!%p2836_p4)
}
 0x273   :  { %2192 = dma.vmem_to_hbm [thread:$0]  %s2190_s27, 128, %s3437_s2, [#allocation3]  }
 0x274   :  { %2848 = dma.done.wait [#allocation3], 128  }
 0x275   :  { %2849 = vsyncadd [#allocation3], 4294967168 }
 0x276   :  { %2196 = vsyncpa [#allocation3], 1 }

</bundles_post_ra>
